<compile_context>
chip_gen: v6e
topology: v6e:2x2x1
jax: 0.10.0
libtpu: 0.0.40
codegen_flags: <defaults>
</compile_context>

<pallas_src>
import functools
import math

import jax
import jax.numpy as jnp
from jax.experimental import pallas as pl
from jax.experimental.pallas import tpu as pltpu


def _round_up(a, b):
    return (a + b - 1) // b * b


def _mlp_kernel(*refs, apply_dropout, keep_threshold, inv_keep_prob):
    if apply_dropout:
        (bits_ref, x_ref, w1_ref, b1_ref, w2_ref, b2_ref,
         logp_ref, pre_ref) = refs
    else:
        x_ref, w1_ref, b1_ref, w2_ref, b2_ref, logp_ref, pre_ref = refs

    # fc1: (bn, F) @ (F, H) + (1, H)   -- bf16 operands, fp32 accumulation.
    pre = jnp.dot(x_ref[...], w1_ref[...],
                  preferred_element_type=jnp.float32) + b1_ref[...]
    pre_ref[...] = pre.astype(pre_ref.dtype)

    # relu (+ dropout) fused into one select; elementwise work stays fp32.
    if apply_dropout:
        keep = bits_ref[...] < jnp.uint32(keep_threshold)
        h = jnp.where(keep, jnp.maximum(pre, 0.0) * inv_keep_prob, 0.0)
    else:
        h = jnp.maximum(pre, 0.0)

    # fc2: (bn, H) @ (H, C) + (1, C)
    logits = jnp.dot(h.astype(w2_ref.dtype), w2_ref[...],
                     preferred_element_type=jnp.float32) + b2_ref[...]

    # log_softmax over dim=1 (classes); exp/log land on the EUP slot.
    m = jnp.max(logits, axis=1, keepdims=True)
    s = logits - m
    lse = jnp.log(jnp.sum(jnp.exp(s), axis=1, keepdims=True))
    logp_ref[...] = (s - lse).astype(logp_ref.dtype)


def mlp_forward(x, params, *, dropout_p, training=False, rng_key=None,
                block_n=256, compute_dtype=jnp.bfloat16,
                vmem_limit_bytes=48 * 1024 * 1024):
    """Pallas implementation of MLP.forward.

    Returns (log_softmax(fc2(dropout(relu(fc1(x))))), fc1(x)).
    Weights are stored pre-transposed as (in_features, out_features).
    """
    w1, b1, w2, b2 = params          # w1: (F, H), b1: (H,), w2: (H, C), b2: (C,)
    N, F = x.shape
    H = w1.shape[1]
    C = w2.shape[1]

    # Large row tile to feed the MXU / amortize per-step overhead; pad N up to
    # a multiple of the tile (padded rows are sliced away afterwards).
    bn = max(8, min(_round_up(block_n, 8), _round_up(N, 8)))
    n_pad = _round_up(N, bn)
    grid = (n_pad // bn,)

    x_p = x if n_pad == N else jnp.pad(x, ((0, n_pad - N), (0, 0)))

    cd = compute_dtype if compute_dtype is not None else x.dtype
    x_c = x_p.astype(cd)
    w1_c = w1.astype(cd)
    w2_c = w2.astype(cd)
    b1_2d = b1.reshape(1, H).astype(jnp.float32)
    b2_2d = b2.reshape(1, C).astype(jnp.float32)

    apply_dropout = bool(training) and float(dropout_p) > 0.0
    keep_prob = 1.0 - float(dropout_p)
    keep_threshold = min(int(round(keep_prob * (2 ** 32))), 2 ** 32 - 1)

    # Weights/biases: constant index_map -> same VMEM block every grid step.
    # TODO(synk): pipeline_mode=pl.Buffered(1) would single-buffer these
    # resident blocks; left at the default depth for lowering compatibility.
    def resident(shape):
        return pl.BlockSpec(shape, lambda i: (0, 0))

    in_specs = [
        pl.BlockSpec((bn, F), lambda i: (i, 0)),    # x row tile
        resident((F, H)),                           # w1 (resident)
        resident((1, H)),                           # b1
        resident((H, C)),                           # w2 (resident)
        resident((1, C)),                           # b2
    ]
    args = [x_c, w1_c, b1_2d, w2_c, b2_2d]

    bits_bytes = 0
    if apply_dropout:
        if rng_key is None:
            rng_key = jax.random.PRNGKey(0)
        bits = jax.random.bits(rng_key, (n_pad, H), dtype=jnp.uint32)
        in_specs.insert(0, pl.BlockSpec((bn, H), lambda i: (i, 0)))
        args.insert(0, bits)
        bits_bytes = bits.size * 4

    kernel = functools.partial(
        _mlp_kernel,
        apply_dropout=apply_dropout,
        keep_threshold=keep_threshold,
        inv_keep_prob=(1.0 / keep_prob) if keep_prob > 0.0 else 0.0,
    )

    itemsize = jnp.dtype(cd).itemsize
    cost = pl.CostEstimate(
        flops=2 * n_pad * (F * H + H * C),
        transcendentals=n_pad * (C + 1),            # exp per logit + log per row
        bytes_accessed=(x_c.size * itemsize + w1_c.size * itemsize
                        + w2_c.size * itemsize + (H + C) * 4 + bits_bytes
                        + n_pad * C * 4 + n_pad * H * 4),
    )

    logp, pre = pl.pallas_call(
        kernel,
        out_shape=(jax.ShapeDtypeStruct((n_pad, C), jnp.float32),
                   jax.ShapeDtypeStruct((n_pad, H), jnp.float32)),
        grid=grid,
        in_specs=in_specs,
        out_specs=(
            pl.BlockSpec((bn, C), lambda i: (i, 0)),   # log_softmax(fc2(...))
            pl.BlockSpec((bn, H), lambda i: (i, 0)),   # pre-relu fc1 output
        ),
        compiler_params=pltpu.CompilerParams(
            dimension_semantics=("parallel",),
            vmem_limit_bytes=vmem_limit_bytes),
        cost_estimate=cost,
    )(*args)

    if n_pad != N:
        logp = logp[:N]
        pre = pre[:N]
    return logp, pre


def init_params(key, nfeat, nhid, nclass):
    """nn.Linear-style init (uniform +/- 1/sqrt(fan_in)); weights stored (in, out)."""
    ks = jax.random.split(key, 2)

    def linear(k, fan_in, fan_out):
        kw, kb = jax.random.split(k)
        bound = 1.0 / math.sqrt(fan_in)
        w = jax.random.uniform(kw, (fan_in, fan_out), jnp.float32, -bound, bound)
        b = jax.random.uniform(kb, (fan_out,), jnp.float32, -bound, bound)
        return w, b

    w1, b1 = linear(ks[0], nfeat, nhid)   # fc1
    w2, b2 = linear(ks[1], nhid, nclass)  # fc2
    # fc3/fc4 exist in __init__ but are unused by forward().
    return (w1, b1, w2, b2)


def reference_forward(x, params, *, compute_dtype=jnp.float32):
    """Pure-JAX reference (eval mode: dropout is identity)."""
    w1, b1, w2, b2 = params
    cd = compute_dtype
    pre = jnp.dot(x.astype(cd), w1.astype(cd),
                  preferred_element_type=jnp.float32) + b1
    h = jnp.maximum(pre, 0.0)
    logits = jnp.dot(h.astype(cd), w2.astype(cd),
                     preferred_element_type=jnp.float32) + b2
    logp = jax.nn.log_softmax(logits, axis=1)
    return logp, pre


if __name__ == "__main__":
    nfeat, nhid, nclass = 32, 64, 8
    N = 20                       # not a multiple of 8 -> exercises pad/slice path
    dropout_p = 0.5

    key = jax.random.PRNGKey(0)
    kx, kp, kd = jax.random.split(key, 3)
    x = jax.random.normal(kx, (N, nfeat), dtype=jnp.float32)
    params = init_params(kp, nfeat, nhid, nclass)

    # eval mode, fp32 matmuls: check against pure-JAX reference
    logp, pre = mlp_forward(x, params, dropout_p=dropout_p, training=False,
                            compute_dtype=jnp.float32)
    logp, pre = jax.block_until_ready((logp, pre))
    ref_logp, ref_pre = reference_forward(x, params, compute_dtype=jnp.float32)
    assert logp.shape == (N, nclass) and pre.shape == (N, nhid)
    assert jnp.allclose(logp, ref_logp, atol=2e-3, rtol=2e-3)
    assert jnp.allclose(pre, ref_pre, atol=2e-3, rtol=2e-3)

    # eval mode, bf16 matmul operands (default fast path), fp32 accumulation
    logp_b, pre_b = mlp_forward(x, params, dropout_p=dropout_p, training=False,
                                compute_dtype=jnp.bfloat16)
    logp_b, pre_b = jax.block_until_ready((logp_b, pre_b))
    ref_logp_b, ref_pre_b = reference_forward(x, params,
                                              compute_dtype=jnp.bfloat16)
    assert jnp.allclose(logp_b, ref_logp_b, atol=2e-2, rtol=2e-2)
    assert jnp.allclose(pre_b, ref_pre_b, atol=2e-2, rtol=2e-2)

    # training mode: dropout active (host-generated uint32 bits streamed in)
    logp_t, pre_t = mlp_forward(x, params, dropout_p=dropout_p, training=True,
                                rng_key=kd)
    logp_t, pre_t = jax.block_until_ready((logp_t, pre_t))
    assert bool(jnp.all(jnp.isfinite(logp_t)))
    assert bool(jnp.all(jnp.isfinite(pre_t)))

    print("KERNEL_OK")
</pallas_src>

<mosaic_0001>
module attributes {stable_mosaic.version = 11 : i64} {
  func.func @_mlp_kernel(%arg0: i32, %arg1: memref<24x32xf32, #tpu.memory_space<vmem>>, %arg2: memref<32x64xf32, #tpu.memory_space<vmem>>, %arg3: memref<1x64xf32, #tpu.memory_space<vmem>>, %arg4: memref<64x8xf32, #tpu.memory_space<vmem>>, %arg5: memref<1x8xf32, #tpu.memory_space<vmem>>, %arg6: memref<24x8xf32, #tpu.memory_space<vmem>>, %arg7: memref<24x64xf32, #tpu.memory_space<vmem>>) attributes {dimension_semantics = [#tpu.dimension_semantics<parallel>], iteration_bounds = array<i64: 1>, scalar_prefetch = 0 : i64, scratch_operands = 0 : i64, tpu.core_type = #tpu.core_type<tc>, window_params = [{transform_indices = @transform_0, window_bounds = array<i64: 24, 32>}, {pipeline_mode = #tpu.pipeline_mode<synchronous>, transform_indices = @transform_1, window_bounds = array<i64: 32, 64>}, {pipeline_mode = #tpu.pipeline_mode<synchronous>, transform_indices = @transform_2, window_bounds = array<i64: 1, 64>}, {pipeline_mode = #tpu.pipeline_mode<synchronous>, transform_indices = @transform_3, window_bounds = array<i64: 64, 8>}, {pipeline_mode = #tpu.pipeline_mode<synchronous>, transform_indices = @transform_4, window_bounds = array<i64: 1, 8>}, {transform_indices = @transform_5, window_bounds = array<i64: 24, 8>}, {transform_indices = @transform_6, window_bounds = array<i64: 24, 64>}]} {
    %c0 = arith.constant 0 : index
    %c0_0 = arith.constant 0 : index
    %0 = vector.load %arg1[%c0, %c0_0] : memref<24x32xf32, #tpu.memory_space<vmem>>, vector<24x32xf32>
    %c0_1 = arith.constant 0 : index
    %c0_2 = arith.constant 0 : index
    %1 = vector.load %arg2[%c0_1, %c0_2] : memref<32x64xf32, #tpu.memory_space<vmem>>, vector<32x64xf32>
    %cst = arith.constant dense<0.000000e+00> : vector<24x64xf32>
    %2 = tpu.matmul %0, %1, %cst {dimension_numbers = #tpu.dot_dimension_numbers<[1], [0], [0], [1], [0, 0, 1, 1], [], []>} : vector<24x32xf32>, vector<32x64xf32>, vector<24x64xf32> -> vector<24x64xf32>
    %c0_3 = arith.constant 0 : index
    %c0_4 = arith.constant 0 : index
    %3 = vector.load %arg3[%c0_3, %c0_4] : memref<1x64xf32, #tpu.memory_space<vmem>>, vector<1x64xf32>
    %4 = vector.broadcast %3 : vector<1x64xf32> to vector<24x64xf32>
    %5 = arith.addf %2, %4 : vector<24x64xf32>
    %c0_5 = arith.constant 0 : index
    %c0_6 = arith.constant 0 : index
    %6 = vector.load %arg7[%c0_5, %c0_6] : memref<24x64xf32, #tpu.memory_space<vmem>>, vector<24x64xf32>
    tpu.vector_store %arg7[%c0_5, %c0_6], %5 {strides = array<i32>} : memref<24x64xf32, #tpu.memory_space<vmem>>, vector<24x64xf32>,
    %cst_7 = arith.constant 0.000000e+00 : f32
    %7 = vector.broadcast %cst_7 : f32 to vector<24x64xf32>
    %8 = arith.maximumf %5, %7 : vector<24x64xf32>
    %c0_8 = arith.constant 0 : index
    %c0_9 = arith.constant 0 : index
    %9 = vector.load %arg4[%c0_8, %c0_9] : memref<64x8xf32, #tpu.memory_space<vmem>>, vector<64x8xf32>
    %cst_10 = arith.constant dense<0.000000e+00> : vector<24x8xf32>
    %10 = tpu.matmul %8, %9, %cst_10 {dimension_numbers = #tpu.dot_dimension_numbers<[1], [0], [0], [1], [0, 0, 1, 1], [], []>} : vector<24x64xf32>, vector<64x8xf32>, vector<24x8xf32> -> vector<24x8xf32>
    %c0_11 = arith.constant 0 : index
    %c0_12 = arith.constant 0 : index
    %11 = vector.load %arg5[%c0_11, %c0_12] : memref<1x8xf32, #tpu.memory_space<vmem>>, vector<1x8xf32>
    %12 = vector.broadcast %11 : vector<1x8xf32> to vector<24x8xf32>
    %13 = arith.addf %10, %12 : vector<24x8xf32>
    %cst_13 = arith.constant dense<0xFF800000> : vector<24xf32>
    %14 = vector.multi_reduction <maximumf>, %13, %cst_13 [1] : vector<24x8xf32> to vector<24xf32>
    %15 = vector.shape_cast %14 : vector<24xf32> to vector<24x1xf32>
    %16 = vector.broadcast %15 : vector<24x1xf32> to vector<24x8xf32>
    %17 = arith.subf %13, %16 : vector<24x8xf32>
    %18 = math.exp %17 : vector<24x8xf32>
    %cst_14 = arith.constant dense<0.000000e+00> : vector<24xf32>
    %19 = vector.multi_reduction <add>, %18, %cst_14 [1] : vector<24x8xf32> to vector<24xf32>
    %20 = vector.shape_cast %19 : vector<24xf32> to vector<24x1xf32>
    %21 = math.log %20 : vector<24x1xf32>
    %22 = vector.broadcast %21 : vector<24x1xf32> to vector<24x8xf32>
    %23 = arith.subf %17, %22 : vector<24x8xf32>
    %c0_15 = arith.constant 0 : index
    %c0_16 = arith.constant 0 : index
    %24 = vector.load %arg6[%c0_15, %c0_16] : memref<24x8xf32, #tpu.memory_space<vmem>>, vector<24x8xf32>
    tpu.vector_store %arg6[%c0_15, %c0_16], %23 {strides = array<i32>} : memref<24x8xf32, #tpu.memory_space<vmem>>, vector<24x8xf32>,
    return
  }
  func.func @transform_0(%arg0: i32) -> (i32, i32) {
    %c0_i32 = arith.constant 0 : i32
    %c0_i32_0 = arith.constant 0 : i32
    return %arg0, %c0_i32 : i32, i32
  }
  func.func @transform_1(%arg0: i32) -> (i32, i32) {
    %c0_i32 = arith.constant 0 : i32
    %c0_i32_0 = arith.constant 0 : i32
    %c0_i32_1 = arith.constant 0 : i32
    return %c0_i32, %c0_i32_0 : i32, i32
  }
  func.func @transform_2(%arg0: i32) -> (i32, i32) {
    %c0_i32 = arith.constant 0 : i32
    %c0_i32_0 = arith.constant 0 : i32
    %c0_i32_1 = arith.constant 0 : i32
    return %c0_i32, %c0_i32_0 : i32, i32
  }
  func.func @transform_3(%arg0: i32) -> (i32, i32) {
    %c0_i32 = arith.constant 0 : i32
    %c0_i32_0 = arith.constant 0 : i32
    %c0_i32_1 = arith.constant 0 : i32
    return %c0_i32, %c0_i32_0 : i32, i32
  }
  func.func @transform_4(%arg0: i32) -> (i32, i32) {
    %c0_i32 = arith.constant 0 : i32
    %c0_i32_0 = arith.constant 0 : i32
    %c0_i32_1 = arith.constant 0 : i32
    return %c0_i32, %c0_i32_0 : i32, i32
  }
  func.func @transform_5(%arg0: i32) -> (i32, i32) {
    %c0_i32 = arith.constant 0 : i32
    %c0_i32_0 = arith.constant 0 : i32
    return %arg0, %c0_i32 : i32, i32
  }
  func.func @transform_6(%arg0: i32) -> (i32, i32) {
    %c0_i32 = arith.constant 0 : i32
    %c0_i32_0 = arith.constant 0 : i32
    return %arg0, %c0_i32 : i32, i32
  }
}

</mosaic_0001>

<bundles_post_ra>
// kernel: tpu_custom_call.1
= control target key start
LH: loop header
LB: loop body
LE: loop exit
PB: predicated region body
PF: predicated region fallthrough
CT: control target
= control target key end

     0   :  { %v405_v1 = vmov 0.0   ;;  %vm406_vm0 = vmmov 0   ;;  %s550_s0 = inlined_call_operand.vmem [shape: f32[24,32], index: 0, kind: input, shape index: {}]   ;;  %s551_s1 = inlined_call_operand.vmem [shape: f32[32,64], index: 1, kind: input, shape index: {}]   ;;  %s552_s2 = inlined_call_operand.vmem [shape: f32[1,64], index: 2, kind: input, shape index: {}]   ;;  %s553_s3 = inlined_call_operand.vmem [shape: f32[64,8], index: 3, kind: input, shape index: {}]   ;;  %s554_s4 = inlined_call_operand.vmem [shape: f32[1,8], index: 4, kind: input, shape index: {}]   ;;  %s555_s5 = inlined_call_operand.vmem [shape: f32[24,8], index: 5, kind: output, shape index: {0}]   ;;  %s556_s6 = inlined_call_operand.hbm [shape: f32[24,64], index: 6, kind: output, shape index: {1}]  }
   0x1   :  { %v29_v0 = vld [vmem:[%s551_s1 + $0x18] sm:$0xff]  ;;  %324 = vmatprep.subr.mxu0 %v405_v1  ;;  %v28_v2 = vld [vmem:[%s551_s1 + $0x10] sm:$0xff]  ;;  %332 = vmatprep.mubr.msk.f32.mxu0 %vm406_vm0, %v405_v1  ;;  %v27_v5 = vld [vmem:[%s551_s1 + $0x8] sm:$0xff] }
   0x2   :  { %325 = vmatpush3.msra.mxu0 %v29_v0  ;;  %341 = vmatprep.subr.mxu1 %v405_v1  ;;  %v141_v3 = vld [vmem:[%s553_s3 + $0x38] sm:$0xff]  ;;  %v140_v4 = vld [vmem:[%s553_s3 + $0x30] sm:$0xff]  ;;  %v139_v6 = vld [vmem:[%s553_s3 + $0x28] sm:$0xff] }
   0x3   :  { %326 = vmatprep.subr.mxu0 %v405_v1  ;;  %342 = vmatpush3.msra.mxu1 %v141_v3 }
   0x4   :  { %327 = vmatpush3.msra.mxu0 %v28_v2  ;;  %343 = vmatprep.subr.mxu1 %v405_v1 }
   0x5   :  { %12 = vsyncpa [#allocation3], 0  ;;  %328 = vmatprep.subr.mxu0 %v405_v1  ;;  %v26_v7 = vld [vmem:[%s551_s1] sm:$0xff]  ;;  %344 = vmatpush3.msra.mxu1 %v140_v4  ;;  %vm37_vm1 = vcmask 261120   ;;  %v137_v10 = vld [vmem:[%s553_s3 + $0x18] sm:$0xff]  ;;  %vm127_vm2 = vcmask 523264  }
   0x6   :  { %329 = vmatpush3.msra.mxu0 %v27_v5  ;;  %v23_v8 = vld [vmem:[%s550_s0] sm:$0xff]  ;;  %345 = vmatprep.subr.mxu1 %v405_v1  ;;  %v24_v11 = vld [vmem:[%s550_s0 + $0x8] sm:$0xff]  ;;  %v25_v12 = vld [vmem:[%s550_s0 + $0x10] sm:$0xff]  ;;  %vm238_vm3 = vcmask 64512  }
   0x7   :  { %v138_v9 = vld [vmem:[%s553_s3 + $0x20] sm:$0xff]  ;;  %330 = vmatprep.subr.mxu0 %v405_v1  ;;  %346 = vmatpush3.msra.mxu1 %v139_v6  ;;  %v136_v13 = vld [vmem:[%s553_s3 + $0x10] sm:$0xff]  ;;  %v135_v14 = vld [vmem:[%s553_s3 + $0x8] sm:$0xff] }
   0x8   :  { %331 = vmatpush3.msra.mxu0 %v26_v7  ;;  %347 = vmatprep.subr.mxu1 %v405_v1  ;;  %v134_v15 = vld [vmem:[%s553_s3] sm:$0xff] }
   0x9   :  { %333 = vmatmul.mubr.msk.f32.vlgmr.msra.gmra.mxu0 %vm37_vm1, %v23_v8  ;;  %348 = vmatpush3.msra.mxu1 %v138_v9  ;;  %v298_v16 = vld [vmem:[%s552_s2] ss:$0 sm:$0xff] }
   0xa   :  { %335 = vmatprep.mubr.msk.f32.mxu0 %vm406_vm0, %v405_v1  ;;  %349 = vmatprep.subr.mxu1 %v405_v1  ;;  %v302_v29 = vld [vmem:[%s554_s4] ss:$0 sm:$0xff]  ;;  %s407_s4 = smov [#allocation2]  }
   0xb   :  { %350 = vmatpush3.msra.mxu1 %v137_v10  ;;  %357 = vmatprep.mubr.msk.f32.mxu1 %vm406_vm0, %v405_v1  ;;  %s285_s27 = sshll.u32 %s407_s4, 4  ;;  %s286_s27 = int_to_ptr.vmem [resolvable:$true] %s285_s27 }
   0xc   :  { %351 = vmatprep.subr.mxu1 %v405_v1  ;;  %s383_s28 = scalar_lea.vmem %s286_s27, 384  ;;  %p388_p1 = scmp.lt.s32.totalorder %s286_s27, %s286_s27 }
   0xd   :  { %336 = vmatmul.mubr.msk.f32.gmra.mxu0 %vm37_vm1, %v24_v11  ;;  %352 = vmatpush3.msra.mxu1 %v136_v13  ;;  %p384_p0 = scmp.ne.s32.totalorder %s286_s27, %s383_s28  ;;  %p389_p2 = scmp.lt.s32.totalorder %s383_s28, %s383_s28 }
   0xe   :  { %338 = vmatprep.mubr.msk.f32.mxu0 %vm406_vm0, %v405_v1  ;;  %353 = vmatprep.subr.mxu1 %v405_v1 }
   0xf   :  { %354 = vmatpush3.msra.mxu1 %v135_v14  ;;  %p390_p3 = por %p389_p2, %p388_p1 }
  0x10   :  { %355 = vmatprep.subr.mxu1 %v405_v1 }
  0x11   :  { %339 = vmatmul.mubr.msk.f32.gmra.mxu0 %vm37_vm1, %v25_v12  ;;  %356 = vmatpush3.msra.mxu1 %v134_v15  ;;  %p391_p4 = pnand %p390_p3, %p384_p0 }
  0xc9   :  { %v113_v17 = vpop.f32.mrf.mxu0 }
  0xca   :  { %v114_v18 = vadd.f32 %v298_v16, %v113_v17 }
  0xcb   :  { %v334_v19 = vpop.f32.mrf.mxu0 }
  0xcc   :  { %128 = vst.msk [vmem:[#allocation2] sm:$0xff] %vm127_vm2, %v114_v18  ;;  %v131_v20 = vmax.f32 %v114_v18, 0.0 }
  0xcd   :  { %v118_v21 = vpop.f32.mrf.mxu0 }
  0xce   :  { %v119_v22 = vadd.f32 %v298_v16, %v118_v21  ;;  %358 = vmatmul.mubr.msk.f32.vlgmr.msra.gmra.mxu1 %vm127_vm2, %v131_v20 }
  0xcf   :  { %v337_v23 = vpop.f32.mrf.mxu0  ;;  %360 = vmatprep.mubr.msk.f32.mxu1 %vm406_vm0, %v405_v1 }
  0xd0   :  { %129 = vst.msk [vmem:[#allocation2 + $0x8] sm:$0xff] %vm127_vm2, %v119_v22  ;;  %v132_v24 = vmax.f32 %v119_v22, 0.0 }
  0xd1   :  { %v123_v25 = vpop.f32.mrf.mxu0 }
  0xd2   :  { %v124_v26 = vadd.f32 %v298_v16, %v123_v25  ;;  %361 = vmatmul.mubr.msk.f32.gmra.mxu1 %vm127_vm2, %v132_v24 }
  0xd3   :  { %v340_v27 = vpop.f32.mrf.mxu0  ;;  %363 = vmatprep.mubr.msk.f32.mxu1 %vm406_vm0, %v405_v1 }
  0xd4   :  { %130 = vst.msk [vmem:[#allocation2 + $0x10] sm:$0xff] %vm127_vm2, %v124_v26  ;;  %v133_v28 = vmax.f32 %v124_v26, 0.0 }
  0xd6   :  { %364 = vmatmul.mubr.msk.f32.gmra.mxu1 %vm127_vm2, %v133_v28 }
 0x18e   :  { %v224_v30 = vpop.f32.mrf.mxu1 }
 0x18f   :  { %v225_v31 = vadd.f32 %v302_v29, %v224_v30 }
 0x190   :  { %v359_v32 = vpop.f32.mrf.mxu1 }
 0x191   :  { %v239_v33 = vsel %vm238_vm3, %v225_v31, -inf }
 0x192   :  { %240 = vmax.xlane.f32.xlu0 %v239_v33  ;;  %v229_v34 = vpop.f32.mrf.mxu1 }
 0x193   :  { %v230_v35 = vadd.f32 %v302_v29, %v229_v34 }
 0x194   :  { %v362_v36 = vpop.f32.mrf.mxu1 }
 0x195   :  { %v242_v37 = vsel %vm238_vm3, %v230_v35, -inf }
 0x196   :  { %243 = vmax.xlane.f32.xlu0 %v242_v37  ;;  %v234_v38 = vpop.f32.mrf.mxu1 }
 0x197   :  { %v235_v39 = vadd.f32 %v302_v29, %v234_v38 }
 0x198   :  { %v365_v40 = vpop.f32.mrf.mxu1 }
 0x199   :  { %v245_v41 = vsel %vm238_vm3, %v235_v39, -inf }
 0x19a   :  { %246 = vmax.xlane.f32.xlu1 %v245_v41 }
 0x21b   :  { %v241_v42 = vpop.xlane.xlu0 %240 }
 0x21c   :  { %v248_v43 = vsub.f32 %v225_v31, %v241_v42 }
 0x21e   :  { %v251_v44 = vmul.f32 1.442695, %v248_v43 }
 0x21f   :  { %v244_v45 = vpop.xlane.xlu0 %243 }
 0x220   :  { %371 = vpow2.f32 %v251_v44  ;;  %v249_v46 = vsub.f32 %v230_v35, %v244_v45 }
 0x222   :  { %v253_v47 = vmul.f32 1.442695, %v249_v46 }
 0x223   :  { %v247_v48 = vpop.xlane.xlu1 %246 }
 0x224   :  { %373 = vpow2.f32 %v253_v47  ;;  %v250_v49 = vsub.f32 %v235_v39, %v247_v48 }
 0x226   :  { %v255_v50 = vmul.f32 1.442695, %v250_v49 }
 0x228   :  { %375 = vpow2.f32 %v255_v50 }
 0x22d   :  { %v372_v51 = vpop.eup %371 }
 0x22e   :  { %v257_v52 = vsel %vm238_vm3, %v372_v51, 0.0 }
 0x22f   :  { %258 = vadd.xlane.f32.xlu1 %v257_v52 }
 0x231   :  { %v374_v53 = vpop.eup %373 }
 0x232   :  { %v260_v54 = vsel %vm238_vm3, %v374_v53, 0.0 }
 0x233   :  { %261 = vadd.xlane.f32.xlu0 %v260_v54 }
 0x235   :  { %v376_v55 = vpop.eup %375 }
 0x236   :  { %v263_v56 = vsel %vm238_vm3, %v376_v55, 0.0 }
 0x237   :  { %264 = vadd.xlane.f32.xlu1 %v263_v56 }
 0x238   :  { %394 = shalt.err (!%p391_p4)
}
 0x239   :  { %s408_s29 = smov 128   ;;  %s409_s30 = smov 8  }
 0x23a   :  { %291 = dma.vmem_to_hbm [thread:$0]  %s286_s27, 384, %s556_s6, [#allocation3], %s408_s29, %s408_s29, %s409_s30  }
 0x2b8   :  { %v259_v57 = vpop.xlane.xlu1 %258 }
 0x2b9   :  { %377 = vlog2.f32 %v259_v57 }
 0x2bc   :  { %v262_v58 = vpop.xlane.xlu0 %261 }
 0x2bd   :  { %379 = vlog2.f32 %v262_v58 }
 0x2c0   :  { %v265_v59 = vpop.xlane.xlu1 %264 }
 0x2c1   :  { %381 = vlog2.f32 %v265_v59 }
 0x2c6   :  { %v378_v60 = vpop.eup %377 }
 0x2c7   :  { %v267_v61 = vmul.f32 0.6931472, %v378_v60 }
 0x2c9   :  { %v272_v62 = vsub.f32 %v248_v43, %v267_v61 }
 0x2ca   :  { %v380_v63 = vpop.eup %379 }
 0x2cb   :  { %275 = vst.msk [vmem:[%s555_s5] sm:$0xff] %vm238_vm3, %v272_v62  ;;  %v269_v0 = vmul.f32 0.6931472, %v380_v63 }
 0x2cd   :  { %v273_v1 = vsub.f32 %v249_v46, %v269_v0 }
 0x2ce   :  { %v382_v2 = vpop.eup %381 }
 0x2cf   :  { %276 = vst.msk [vmem:[%s555_s5 + $0x8] sm:$0xff] %vm238_vm3, %v273_v1  ;;  %v271_v3 = vmul.f32 0.6931472, %v382_v2 }
 0x2d1   :  { %v274_v4 = vsub.f32 %v250_v49, %v271_v3 }
 0x2d3   :  { %277 = vst.msk [vmem:[%s555_s5 + $0x10] sm:$0xff] %vm238_vm3, %v274_v4 }
 0x2d4   :  { %403 = dma.done.wait [#allocation3], 384  }
 0x2d5   :  { %404 = vsyncadd [#allocation3], 4294966912 }
 0x2d6   :  { %297 = vsyncpa [#allocation3], 1 }

</bundles_post_ra>
